<compile_context>
chip_gen: v5e
topology: v5e:2x2
jax: 0.10.0
libtpu: 0.0.40
codegen_flags: <defaults>
</compile_context>

<pallas_src>
import jax
import jax.numpy as jnp
from jax.experimental import pallas as pl
from jax.experimental.pallas import tpu as pltpu


# Flip to True on builds where pl.Buffered(1) is supported to halve
# resident-weight VMEM (weights are already fetched only once thanks to the
# constant index_map; this only changes the allocation, not the DMA count).
SINGLE_BUFFER_WEIGHTS = False


def baseconv_kernel(u_ref, wcat_ref, bcat_ref, woT_ref, bo_ref,
                    ck_ref, cb_ref, bw1_ref, o_ref):
    Bt, L, Dp = u_ref.shape
    K = ck_ref.shape[0]
    M = Bt * L

    u_bf = u_ref[...].reshape(M, Dp)               # bf16 slab (Bt*L, Dp)

    # Fused in_proj + projection: one MXU pass with N = 2*Dp.
    xcat = jnp.dot(u_bf, wcat_ref[...],
                   preferred_element_type=jnp.float32) + bcat_ref[...]
    x_in = xcat[:, :Dp]                            # in_proj output
    u_proj = xcat[:, Dp:]                          # projection (gate) output

    # Depthwise causal conv (Conv1d(d, d, K, groups=d, padding=K-1)[..., :L]):
    #   y[t, c] = sum_s ck[K-1-s, c] * x_in[t-s, c]
    # pltpu.roll shifts the flattened slab along sublanes (XLU slot, otherwise
    # idle); a single (M,1) row-in-sequence index masks taps that would cross
    # a causal / sequence boundary (the roll wraps across sequences; the mask
    # zeroes exactly those rows).
    ck = ck_ref[...]
    row = jax.lax.broadcasted_iota(jnp.int32, (M, 1), 0)
    pos = (row & (L - 1)) if (L & (L - 1)) == 0 else (row % L)
    acc = x_in * ck[K - 1].reshape(1, Dp)
    for s in range(1, K):                          # static unroll, K is tiny
        tap = pltpu.roll(x_in, shift=s, axis=0)
        acc = acc + jnp.where(pos >= s, tap, 0.0) * ck[K - 1 - s].reshape(1, Dp)
    u_conv = acc + cb_ref[...]

    # out_proj of the gated product (bw[0] already folded into woT / bo).
    # TODO(synk): if bundle profiles show the MXU idle during this VPU phase,
    # split M in half and interleave matmul(half0) with conv/gate(half1).
    gated = (u_conv * u_proj).astype(jnp.bfloat16)
    y = jnp.dot(gated, woT_ref[...],
                preferred_element_type=jnp.float32) + bo_ref[...]

    # Residual: bw[0]*y is already inside y; add bw[1]*u.
    out = y + bw1_ref[0] * u_bf.astype(jnp.float32)
    o_ref[...] = out.reshape(Bt, L, Dp)


def _pick_batch_tile(B, L, Dp):
    """Sequences per grid step.

    Target >= 512 MXU rows (Bt*L) per step, capped by a per-step activation
    VMEM budget.  No minimum-grid-steps rule: on single-TC v5e/v6e extra steps
    only add ~0.35us/step overhead and shrink M; on v7x a megacore split only
    pays once each half is itself MXU-efficient.  Bt need not divide B.
    """
    rows_target = 512
    bt = max(1, min(B, -(-rows_target // L)))
    # Per-sequence VMEM: bf16 input x2 bufs + f32 output x2 bufs + ~3 f32
    # (L, 2*Dp)-ish intermediate slabs (xcat / conv / gate).
    per_seq_bytes = L * Dp * (2 * 2 + 2 * 4 + 3 * 2 * 4)
    budget = 20 << 20
    bt = max(1, min(bt, budget // max(per_seq_bytes, 1)))
    return bt


def _vmem_limit_bytes(Bt, L, Dp, K, weight_buffers):
    """Explicit scoped-VMEM request: resident weights + activation double
    buffers + intermediates, 2x headroom, 16 MiB floor, 64 MiB (v7x) cap."""
    w = weight_buffers * (Dp * (2 * Dp) * 2 + Dp * Dp * 2)       # bf16 weight mats
    small = weight_buffers * (2 * Dp + Dp + K * Dp + Dp) * 4     # biases / conv taps
    act = 2 * Bt * L * Dp * 2 + 2 * Bt * L * Dp * 4              # in bf16 x2, out f32 x2
    temps = 3 * Bt * L * (2 * Dp) * 4                            # xcat / conv / gate slabs
    need = w + small + act + temps
    return int(min(max(2 * need, 16 << 20), 64 << 20))


def prepare_params(Wi, bi, Wp, bp, Wo, bo, ck, cb, bw):
    """One-time kernel-layout weight prep (transpose / fuse / pad / bf16 cast).

    Linear weights are PyTorch-layout (out, in); ck is (K, d); bw is (2,).
    """
    D = Wi.shape[0]
    Dp = -(-D // 128) * 128                        # pad channels to lane width

    def pad2(w):
        return jnp.pad(w, ((0, Dp - D), (0, Dp - D)))

    def pad1(v):
        return jnp.pad(v, (0, Dp - D))

    # in_proj and projection fused into one (Dp, 2*Dp) right-hand side.
    w_cat = jnp.concatenate([pad2(Wi.T), pad2(Wp.T)], axis=1).astype(jnp.bfloat16)
    b_cat = jnp.concatenate([pad1(bi), pad1(bp)]).reshape(1, 2 * Dp).astype(jnp.float32)

    # bw[0] folded into out_proj so the kernel epilogue is just y + bw[1]*u.
    woT = pad2(Wo.T * bw[0]).astype(jnp.bfloat16)
    bo_s = pad1(bo * bw[0]).reshape(1, Dp).astype(jnp.float32)

    ck_p = jnp.pad(ck, ((0, 0), (0, Dp - D))).astype(jnp.float32)
    cb_p = pad1(cb).reshape(1, Dp).astype(jnp.float32)
    bw1 = bw[1:2].astype(jnp.float32)

    return dict(w_cat=w_cat, b_cat=b_cat, woT=woT, bo=bo_s,
                ck=ck_p, cb=cb_p, bw1=bw1)


@jax.jit
def base_conv_layer(u, params):
    """u: (B, L, D) activations; params from prepare_params. Returns (B, L, D) f32."""
    B, L, D = u.shape
    Dp = params["woT"].shape[0]
    K = params["ck"].shape[0]
    assert L % 8 == 0, "pad L to a multiple of 8 so the kernel reshapes stay free"

    # TODO(synk): keep activations at Dp (and in bf16) model-wide so these
    # wrapper-side pad / cast / slice HBM passes disappear entirely.
    if Dp != D:
        u = jnp.pad(u, ((0, 0), (0, 0), (0, Dp - D)))

    Bt = _pick_batch_tile(B, L, Dp)
    nb = pl.cdiv(B, Bt)
    if nb * Bt != B:                               # Bt need not divide B
        u = jnp.pad(u, ((0, nb * Bt - B), (0, 0), (0, 0)))
    u_bf = u.astype(jnp.bfloat16)

    weight_buffers = 1 if SINGLE_BUFFER_WEIGHTS else 2

    def w_spec(shape):
        idx = lambda b: (0,) * len(shape)          # grid-resident: fetched once
        if SINGLE_BUFFER_WEIGHTS:
            return pl.BlockSpec(shape, idx, pipeline_mode=pl.Buffered(1))
        return pl.BlockSpec(shape, idx)

    # TODO(synk): for Dp >= ~1536 on v7x (64 MiB physical VMEM), add an
    # "arbitrary" grid axis tiling the N dim of w_cat / woT so only a (Dp, tn)
    # weight slice is resident per step.
    out = pl.pallas_call(
        baseconv_kernel,
        out_shape=jax.ShapeDtypeStruct((nb * Bt, L, Dp), jnp.float32),
        grid_spec=pltpu.PrefetchScalarGridSpec(
            num_scalar_prefetch=0,
            grid=(nb,),
            in_specs=[
                pl.BlockSpec((Bt, L, Dp), lambda b: (b, 0, 0)),     # u (bf16)
                w_spec((Dp, 2 * Dp)),                               # [Wi.T | Wp.T] bf16
                w_spec((1, 2 * Dp)),                                # [bi | bp]
                w_spec((Dp, Dp)),                                   # Wo.T * bw0 bf16
                w_spec((1, Dp)),                                    # bo * bw0
                w_spec((K, Dp)),                                    # conv kernel
                w_spec((1, Dp)),                                    # conv bias
                pl.BlockSpec(memory_space=pltpu.MemorySpace.SMEM),  # bw[1]
            ],
            out_specs=pl.BlockSpec((Bt, L, Dp), lambda b: (b, 0, 0)),
        ),
        compiler_params=pltpu.CompilerParams(
            dimension_semantics=("parallel",),
            vmem_limit_bytes=_vmem_limit_bytes(Bt, L, Dp, K, weight_buffers)),
    )(u_bf, params["w_cat"], params["b_cat"], params["woT"], params["bo"],
      params["ck"], params["cb"], params["bw1"])

    return out[:B, :, :D]


def reference(u, Wi, bi, Wp, bp, Wo, bo, ck, cb, bw):
    """Pure-JAX f32 reference mirroring the PyTorch forward."""
    B, L, D = u.shape
    K = ck.shape[0]
    x_in = u @ Wi.T + bi
    pad = jnp.pad(x_in, ((0, 0), (K - 1, 0), (0, 0)))
    u_conv = sum(pad[:, j:j + L, :] * ck[j][None, None, :] for j in range(K)) + cb
    u_proj = u @ Wp.T + bp
    y = (u_conv * u_proj) @ Wo.T + bo
    return bw[0] * y + bw[1] * u


def _linear_init(key, out_f, in_f):
    kw, kb = jax.random.split(key)
    bound = 1.0 / jnp.sqrt(in_f)
    W = jax.random.uniform(kw, (out_f, in_f), jnp.float32, -bound, bound)
    b = jax.random.uniform(kb, (out_f,), jnp.float32, -bound, bound)
    return W, b


if __name__ == "__main__":
    # batch, seq (l_max), d_model (n_embd, lane-aligned), conv kernel size
    B, L, D, K = 4, 16, 128, 3

    key = jax.random.PRNGKey(0)
    k_u, k_in, k_proj, k_out, k_ck, k_cb = jax.random.split(key, 6)

    u = jax.random.normal(k_u, (B, L, D), jnp.float32)

    Wi, bi = _linear_init(k_in, D, D)       # in_proj
    Wp, bp = _linear_init(k_proj, D, D)     # projection
    Wo, bo = _linear_init(k_out, D, D)      # out_proj

    # ShortConvolution: Conv1d(d, d, K, groups=d) -> weight (d, 1, K) stored (K, d)
    cbound = 1.0 / jnp.sqrt(K)
    ck = jax.random.uniform(k_ck, (K, D), jnp.float32, -cbound, cbound)
    cb = jax.random.uniform(k_cb, (D,), jnp.float32, -cbound, cbound)

    # branch_weights: zeros with data[0] = 1  (resid=True)
    bw = jnp.array([1.0, 0.0], jnp.float32)

    params = prepare_params(Wi, bi, Wp, bp, Wo, bo, ck, cb, bw)
    out = jax.block_until_ready(base_conv_layer(u, params))

    ref = reference(u, Wi, bi, Wp, bp, Wo, bo, ck, cb, bw)
    assert out.shape == (B, L, D)
    max_err = float(jnp.max(jnp.abs(out - ref)))
    # bf16 activations + bf16 matmul operands (f32 accumulation) vs f32 ref.
    assert jnp.allclose(out, ref, atol=5e-2, rtol=5e-2), f"max abs err {max_err}"

    print("KERNEL_OK")
</pallas_src>

<mosaic_0001>
module attributes {stable_mosaic.version = 11 : i64} {
  func.func @baseconv_kernel(%arg0: i32, %arg1: memref<4x16x128xbf16, #tpu.memory_space<vmem>>, %arg2: memref<128x256xbf16, #tpu.memory_space<vmem>>, %arg3: memref<1x256xf32, #tpu.memory_space<vmem>>, %arg4: memref<128x128xbf16, #tpu.memory_space<vmem>>, %arg5: memref<1x128xf32, #tpu.memory_space<vmem>>, %arg6: memref<3x128xf32, #tpu.memory_space<vmem>>, %arg7: memref<1x128xf32, #tpu.memory_space<vmem>>, %arg8: memref<1xf32, #tpu.memory_space<smem>>, %arg9: memref<4x16x128xf32, #tpu.memory_space<vmem>>) attributes {dimension_semantics = [#tpu.dimension_semantics<parallel>], iteration_bounds = array<i64: 1>, scalar_prefetch = 0 : i64, scratch_operands = 0 : i64, tpu.core_type = #tpu.core_type<tc>, window_params = [{transform_indices = @transform_0, window_bounds = array<i64: 4, 16, 128>}, {pipeline_mode = #tpu.pipeline_mode<synchronous>, transform_indices = @transform_1, window_bounds = array<i64: 128, 256>}, {pipeline_mode = #tpu.pipeline_mode<synchronous>, transform_indices = @transform_2, window_bounds = array<i64: 1, 256>}, {pipeline_mode = #tpu.pipeline_mode<synchronous>, transform_indices = @transform_3, window_bounds = array<i64: 128, 128>}, {pipeline_mode = #tpu.pipeline_mode<synchronous>, transform_indices = @transform_4, window_bounds = array<i64: 1, 128>}, {pipeline_mode = #tpu.pipeline_mode<synchronous>, transform_indices = @transform_5, window_bounds = array<i64: 3, 128>}, {pipeline_mode = #tpu.pipeline_mode<synchronous>, transform_indices = @transform_6, window_bounds = array<i64: 1, 128>}, {transform_indices = @transform_7, window_bounds = array<i64: 1>}, {transform_indices = @transform_8, window_bounds = array<i64: 4, 16, 128>}]} {
    %c0 = arith.constant 0 : index
    %c0_0 = arith.constant 0 : index
    %c0_1 = arith.constant 0 : index
    %0 = vector.load %arg1[%c0, %c0_0, %c0_1] : memref<4x16x128xbf16, #tpu.memory_space<vmem>>, vector<4x16x128xbf16>
    %1 = vector.shape_cast %0 : vector<4x16x128xbf16> to vector<64x128xbf16>
    %c0_2 = arith.constant 0 : index
    %c0_3 = arith.constant 0 : index
    %2 = vector.load %arg2[%c0_2, %c0_3] : memref<128x256xbf16, #tpu.memory_space<vmem>>, vector<128x256xbf16>
    %cst = arith.constant dense<0.000000e+00> : vector<64x256xf32>
    %3 = tpu.matmul %1, %2, %cst {dimension_numbers = #tpu.dot_dimension_numbers<[1], [0], [0], [1], [0, 0, 1, 1], [], []>} : vector<64x128xbf16>, vector<128x256xbf16>, vector<64x256xf32> -> vector<64x256xf32>
    %c0_4 = arith.constant 0 : index
    %c0_5 = arith.constant 0 : index
    %4 = vector.load %arg3[%c0_4, %c0_5] : memref<1x256xf32, #tpu.memory_space<vmem>>, vector<1x256xf32>
    %5 = vector.broadcast %4 : vector<1x256xf32> to vector<64x256xf32>
    %6 = arith.addf %3, %5 : vector<64x256xf32>
    %7 = vector.extract_strided_slice %6 {offsets = [0, 0], sizes = [64, 128], strides = [1, 1]} : vector<64x256xf32> to vector<64x128xf32>
    %8 = vector.extract_strided_slice %6 {offsets = [0, 128], sizes = [64, 128], strides = [1, 1]} : vector<64x256xf32> to vector<64x128xf32>
    %c0_6 = arith.constant 0 : index
    %c0_7 = arith.constant 0 : index
    %9 = vector.load %arg6[%c0_6, %c0_7] : memref<3x128xf32, #tpu.memory_space<vmem>>, vector<3x128xf32>
    %10 = tpu.iota {dimensions = array<i32: 0>} : vector<64x1xi32>
    %c15_i32 = arith.constant 15 : i32
    %11 = vector.broadcast %c15_i32 : i32 to vector<64x1xi32>
    %12 = arith.andi %10, %11 : vector<64x1xi32>
    %13 = vector.extract_strided_slice %9 {offsets = [2, 0], sizes = [1, 128], strides = [1, 1]} : vector<3x128xf32> to vector<1x128xf32>
    %14 = vector.shape_cast %13 : vector<1x128xf32> to vector<128xf32>
    %15 = vector.shape_cast %14 : vector<128xf32> to vector<1x128xf32>
    %16 = vector.broadcast %15 : vector<1x128xf32> to vector<64x128xf32>
    %17 = arith.mulf %7, %16 : vector<64x128xf32>
    %c1_i32 = arith.constant 1 : i32
    %18 = tpu.dynamic_rotate %7 by %c1_i32 dim 0 : vector<64x128xf32>, i32 -> vector<64x128xf32>
    %c1_i32_8 = arith.constant 1 : i32
    %19 = vector.broadcast %c1_i32_8 : i32 to vector<64x1xi32>
    %20 = arith.cmpi sge, %12, %19 : vector<64x1xi32>
    %cst_9 = arith.constant 0.000000e+00 : f32
    %21 = vector.shape_cast %20 : vector<64x1xi1> to vector<64x1xi1>
    %22 = vector.broadcast %21 : vector<64x1xi1> to vector<64x128xi1>
    %23 = vector.broadcast %cst_9 : f32 to vector<64x128xf32>
    %24 = arith.select %22, %18, %23 : vector<64x128xi1>, vector<64x128xf32>
    %25 = vector.extract_strided_slice %9 {offsets = [1, 0], sizes = [1, 128], strides = [1, 1]} : vector<3x128xf32> to vector<1x128xf32>
    %26 = vector.shape_cast %25 : vector<1x128xf32> to vector<128xf32>
    %27 = vector.shape_cast %26 : vector<128xf32> to vector<1x128xf32>
    %28 = vector.broadcast %27 : vector<1x128xf32> to vector<64x128xf32>
    %29 = arith.mulf %24, %28 : vector<64x128xf32>
    %30 = arith.addf %17, %29 : vector<64x128xf32>
    %c2_i32 = arith.constant 2 : i32
    %31 = tpu.dynamic_rotate %7 by %c2_i32 dim 0 : vector<64x128xf32>, i32 -> vector<64x128xf32>
    %c2_i32_10 = arith.constant 2 : i32
    %32 = vector.broadcast %c2_i32_10 : i32 to vector<64x1xi32>
    %33 = arith.cmpi sge, %12, %32 : vector<64x1xi32>
    %cst_11 = arith.constant 0.000000e+00 : f32
    %34 = vector.shape_cast %33 : vector<64x1xi1> to vector<64x1xi1>
    %35 = vector.broadcast %34 : vector<64x1xi1> to vector<64x128xi1>
    %36 = vector.broadcast %cst_11 : f32 to vector<64x128xf32>
    %37 = arith.select %35, %31, %36 : vector<64x128xi1>, vector<64x128xf32>
    %38 = vector.extract_strided_slice %9 {offsets = [0, 0], sizes = [1, 128], strides = [1, 1]} : vector<3x128xf32> to vector<1x128xf32>
    %39 = vector.shape_cast %38 : vector<1x128xf32> to vector<128xf32>
    %40 = vector.shape_cast %39 : vector<128xf32> to vector<1x128xf32>
    %41 = vector.broadcast %40 : vector<1x128xf32> to vector<64x128xf32>
    %42 = arith.mulf %37, %41 : vector<64x128xf32>
    %43 = arith.addf %30, %42 : vector<64x128xf32>
    %c0_12 = arith.constant 0 : index
    %c0_13 = arith.constant 0 : index
    %44 = vector.load %arg7[%c0_12, %c0_13] : memref<1x128xf32, #tpu.memory_space<vmem>>, vector<1x128xf32>
    %45 = vector.broadcast %44 : vector<1x128xf32> to vector<64x128xf32>
    %46 = arith.addf %43, %45 : vector<64x128xf32>
    %47 = arith.mulf %46, %8 : vector<64x128xf32>
    %48 = arith.truncf %47 : vector<64x128xf32> to vector<64x128xbf16>
    %c0_14 = arith.constant 0 : index
    %c0_15 = arith.constant 0 : index
    %49 = vector.load %arg4[%c0_14, %c0_15] : memref<128x128xbf16, #tpu.memory_space<vmem>>, vector<128x128xbf16>
    %cst_16 = arith.constant dense<0.000000e+00> : vector<64x128xf32>
    %50 = tpu.matmul %48, %49, %cst_16 {dimension_numbers = #tpu.dot_dimension_numbers<[1], [0], [0], [1], [0, 0, 1, 1], [], []>} : vector<64x128xbf16>, vector<128x128xbf16>, vector<64x128xf32> -> vector<64x128xf32>
    %c0_17 = arith.constant 0 : index
    %c0_18 = arith.constant 0 : index
    %51 = vector.load %arg5[%c0_17, %c0_18] : memref<1x128xf32, #tpu.memory_space<vmem>>, vector<1x128xf32>
    %52 = vector.broadcast %51 : vector<1x128xf32> to vector<64x128xf32>
    %53 = arith.addf %50, %52 : vector<64x128xf32>
    %c0_19 = arith.constant 0 : index
    %54 = memref.load %arg8[%c0_19] : memref<1xf32, #tpu.memory_space<smem>>
    %55 = arith.extf %1 : vector<64x128xbf16> to vector<64x128xf32>
    %56 = vector.broadcast %54 : f32 to vector<64x128xf32>
    %57 = arith.mulf %56, %55 : vector<64x128xf32>
    %58 = arith.addf %53, %57 : vector<64x128xf32>
    %59 = vector.shape_cast %58 : vector<64x128xf32> to vector<4x16x128xf32>
    %c0_20 = arith.constant 0 : index
    %c0_21 = arith.constant 0 : index
    %c0_22 = arith.constant 0 : index
    %60 = vector.load %arg9[%c0_20, %c0_21, %c0_22] : memref<4x16x128xf32, #tpu.memory_space<vmem>>, vector<4x16x128xf32>
    tpu.vector_store %arg9[%c0_20, %c0_21, %c0_22], %59 {strides = array<i32>} : memref<4x16x128xf32, #tpu.memory_space<vmem>>, vector<4x16x128xf32>,
    return
  }
  func.func @transform_0(%arg0: i32) -> (i32, i32, i32) {
    %c0_i32 = arith.constant 0 : i32
    %c0_i32_0 = arith.constant 0 : i32
    %c0_i32_1 = arith.constant 0 : i32
    return %arg0, %c0_i32, %c0_i32_0 : i32, i32, i32
  }
  func.func @transform_1(%arg0: i32) -> (i32, i32) {
    %c0_i32 = arith.constant 0 : i32
    %c0_i32_0 = arith.constant 0 : i32
    %c0_i32_1 = arith.constant 0 : i32
    return %c0_i32, %c0_i32_0 : i32, i32
  }
  func.func @transform_2(%arg0: i32) -> (i32, i32) {
    %c0_i32 = arith.constant 0 : i32
    %c0_i32_0 = arith.constant 0 : i32
    %c0_i32_1 = arith.constant 0 : i32
    return %c0_i32, %c0_i32_0 : i32, i32
  }
  func.func @transform_3(%arg0: i32) -> (i32, i32) {
    %c0_i32 = arith.constant 0 : i32
    %c0_i32_0 = arith.constant 0 : i32
    %c0_i32_1 = arith.constant 0 : i32
    return %c0_i32, %c0_i32_0 : i32, i32
  }
  func.func @transform_4(%arg0: i32) -> (i32, i32) {
    %c0_i32 = arith.constant 0 : i32
    %c0_i32_0 = arith.constant 0 : i32
    %c0_i32_1 = arith.constant 0 : i32
    return %c0_i32, %c0_i32_0 : i32, i32
  }
  func.func @transform_5(%arg0: i32) -> (i32, i32) {
    %c0_i32 = arith.constant 0 : i32
    %c0_i32_0 = arith.constant 0 : i32
    %c0_i32_1 = arith.constant 0 : i32
    return %c0_i32, %c0_i32_0 : i32, i32
  }
  func.func @transform_6(%arg0: i32) -> (i32, i32) {
    %c0_i32 = arith.constant 0 : i32
    %c0_i32_0 = arith.constant 0 : i32
    %c0_i32_1 = arith.constant 0 : i32
    return %c0_i32, %c0_i32_0 : i32, i32
  }
  func.func @transform_7(%arg0: i32) -> i32 {
    %c0_i32 = arith.constant 0 : i32
    %c0_i32_0 = arith.constant 0 : i32
    return %c0_i32 : i32
  }
  func.func @transform_8(%arg0: i32) -> (i32, i32, i32) {
    %c0_i32 = arith.constant 0 : i32
    %c0_i32_0 = arith.constant 0 : i32
    %c0_i32_1 = arith.constant 0 : i32
    return %arg0, %c0_i32, %c0_i32_0 : i32, i32, i32
  }
}

</mosaic_0001>

<bundles_post_ra>
// kernel: base_conv_layer.1
= control target key start
LH: loop header
LB: loop body
LE: loop exit
PB: predicated region body
PF: predicated region fallthrough
CT: control target
= control target key end

     0   :  { %14 = vsyncpa [#allocation4], 0  ;;  %s1053_s0 = inlined_call_operand.vmem [shape: bf16[4,16,128], index: 0, kind: input, shape index: {}]   ;;  %s1054_s1 = inlined_call_operand.hbm [shape: bf16[128,256], index: 1, kind: input, shape index: {}]   ;;  %s1055_s2 = inlined_call_operand.vmem [shape: f32[1,256], index: 2, kind: input, shape index: {}]   ;;  %s1056_s3 = inlined_call_operand.vmem [shape: bf16[128,128], index: 3, kind: input, shape index: {}]   ;;  %s1057_s4 = inlined_call_operand.vmem [shape: f32[1,128], index: 4, kind: input, shape index: {}]   ;;  %s1058_s5 = inlined_call_operand.vmem [shape: f32[3,128], index: 5, kind: input, shape index: {}]   ;;  %s1059_s6 = inlined_call_operand.vmem [shape: f32[1,128], index: 6, kind: input, shape index: {}]   ;;  %s1060_s7 = inlined_call_operand.<no memory space> [shape: f32[1], index: 7, kind: input, shape index: {}]   ;;  %s1061_s8 = inlined_call_operand.hbm [shape: f32[4,16,128], index: 8, kind: output, shape index: {}]  }
   0x1   :  { %15 = vsyncpa [#allocation5], 0  ;;  %s22_s29 = sshll.u32 %s1054_s1, 4  ;;  %s778_s30 = smov [#allocation3]   ;;  %s23_s29 = int_to_ptr.hbm [resolvable:$true] %s22_s29 }
   0x2   :  { %s24_s9 = sshll.u32 %s778_s30, 4  ;;  %s779_s10 = smov 128   ;;  %s25_s9 = int_to_ptr.vmem [resolvable:$true] %s24_s9 }
   0x3   :  { %s780_s11 = smov 8  }
   0x4   :  { %30 = dma.hbm_to_vmem [thread:$0]  %s23_s29, 2048, %s25_s9, [#allocation4], %s779_s10, %s779_s10, %s780_s11  }
   0x5   :  { %774 = dma.done.wait [#allocation4], 2048  }
   0x6   :  { %775 = vsyncadd [#allocation4], 4294965248  ;;  %v646_v0 = vld [vmem:[#allocation3 + $0x70] sm:$0xf]  ;;  %v703_v1 = vld [vmem:[#allocation3 + $0x74] sm:$0xf0] }
   0x7   :  { %v702_v2 = vld [vmem:[#allocation3 + $0x74] sm:$0xf]  ;;  %v647_v3 = vor.u32 %v703_v1, %v646_v0  ;;  %v648_v4 = vld [vmem:[#allocation3 + $0x78] sm:$0xf0]  ;;  %v638_v5 = vld [vmem:[#allocation3 + $0x60] sm:$0xf] }
   0x8   :  { %v701_v6 = vld [vmem:[#allocation3 + $0x64] sm:$0xf0]  ;;  %v651_v7 = vor.u32 %v702_v2, %v648_v4  ;;  %v700_v8 = vld [vmem:[#allocation3 + $0x64] sm:$0xf]  ;;  %v640_v9 = vld [vmem:[#allocation3 + $0x68] sm:$0xf0] }
   0x9   :  { %181 = vmatpush.bf16.msra.mxu0 %v647_v3  ;;  %712 = vmatpush.bf16.msra.mxu3 %v647_v3  ;;  %v639_v10 = vor.u32 %v701_v6, %v638_v5  ;;  %v643_v11 = vor.u32 %v700_v8, %v640_v9  ;;  %v630_v12 = vld [vmem:[#allocation3 + $0x50] sm:$0xf]  ;;  %v699_v13 = vld [vmem:[#allocation3 + $0x54] sm:$0xf0]  ;;  %v698_v14 = vld [vmem:[#allocation3 + $0x54] sm:$0xf]  ;;  %v240_v6 = vlaneseq }
   0xa   :  { %210 = vmatpush.bf16.msra.mxu1 %v651_v7  ;;  %v632_v15 = vld [vmem:[#allocation3 + $0x58] sm:$0xf0]  ;;  %v631_v16 = vor.u32 %v699_v13, %v630_v12  ;;  %v622_v18 = vld [vmem:[#allocation3 + $0x40] sm:$0xf]  ;;  %v697_v19 = vld [vmem:[#allocation3 + $0x44] sm:$0xf0] }
   0xb   :  { %v635_v17 = vor.u32 %v698_v14, %v632_v15  ;;  %v696_v20 = vld [vmem:[#allocation3 + $0x44] sm:$0xf]  ;;  %v624_v21 = vld [vmem:[#allocation3 + $0x48] sm:$0xf0]  ;;  %v623_v22 = vor.u32 %v697_v19, %v622_v18  ;;  %v614_v24 = vld [vmem:[#allocation3 + $0x30] sm:$0xf] }
   0xc   :  { %v627_v23 = vor.u32 %v696_v20, %v624_v21  ;;  %v695_v25 = vld [vmem:[#allocation3 + $0x34] sm:$0xf0]  ;;  %v694_v26 = vld [vmem:[#allocation3 + $0x34] sm:$0xf]  ;;  %v616_v27 = vld [vmem:[#allocation3 + $0x38] sm:$0xf0] }
   0xd   :  { %182 = vmatpush.bf16.msra.mxu0 %v639_v10  ;;  %713 = vmatpush.bf16.msra.mxu3 %v639_v10  ;;  %v615_v28 = vor.u32 %v695_v25, %v614_v24  ;;  %v619_v29 = vor.u32 %v694_v26, %v616_v27  ;;  %v606_v30 = vld [vmem:[#allocation3 + $0x20] sm:$0xf]  ;;  %v693_v31 = vld [vmem:[#allocation3 + $0x24] sm:$0xf0]  ;;  %v692_v32 = vld [vmem:[#allocation3 + $0x24] sm:$0xf] }
   0xe   :  { %211 = vmatpush.bf16.msra.mxu1 %v643_v11  ;;  %v608_v33 = vld [vmem:[#allocation3 + $0x28] sm:$0xf0]  ;;  %v607_v34 = vor.u32 %v693_v31, %v606_v30  ;;  %v598_v36 = vld [vmem:[#allocation3 + $0x10] sm:$0xf]  ;;  %v691_v37 = vld [vmem:[#allocation3 + $0x14] sm:$0xf0] }
   0xf   :  { %v611_v35 = vor.u32 %v692_v32, %v608_v33  ;;  %v690_v38 = vld [vmem:[#allocation3 + $0x14] sm:$0xf]  ;;  %v600_v39 = vld [vmem:[#allocation3 + $0x18] sm:$0xf0]  ;;  %v599_v40 = vor.u32 %v691_v37, %v598_v36  ;;  %v590_v42 = vld [vmem:[#allocation3] sm:$0xf] }
  0x10   :  { %v603_v41 = vor.u32 %v690_v38, %v600_v39  ;;  %v689_v43 = vld [vmem:[#allocation3 + $0x4] sm:$0xf0]  ;;  %v688_v44 = vld [vmem:[#allocation3 + $0x4] sm:$0xf]  ;;  %v592_v45 = vld [vmem:[#allocation3 + $0x8] sm:$0xf0] }
  0x11   :  { %183 = vmatpush.bf16.msra.mxu0 %v631_v16  ;;  %714 = vmatpush.bf16.msra.mxu3 %v631_v16  ;;  %v591_v46 = vor.u32 %v689_v43, %v590_v42  ;;  %v595_v47 = vor.u32 %v688_v44, %v592_v45  ;;  %v684_v48 = vld [vmem:[%s1053_s0] sm:$0xff]  ;;  %v685_v49 = vld [vmem:[%s1053_s0 + $0x8] sm:$0xff]  ;;  %v686_v50 = vld [vmem:[%s1053_s0 + $0x10] sm:$0xff]  ;;  %v880_v9 = vshrl.u32 %v240_v6, 7  ;;  %s781_s26 = smov [#allocation6]   ;;  %s559_s30 = sshll.u32 %s1061_s8, 4  ;;  %s560_s30 = int_to_ptr.hbm [resolvable:$true] %s559_s30 }
  0x12   :  { %212 = vmatpush.bf16.msra.mxu1 %v635_v17  ;;  %v687_v51 = vld [vmem:[%s1053_s0 + $0x18] sm:$0xff]  ;;  %v710_v53 = vld [vmem:[%s1056_s3 + $0x30] sm:$0xff]  ;;  %v709_v55 = vld [vmem:[%s1056_s3 + $0x28] sm:$0xff]  ;;  %s557_s27 = sshll.u32 %s781_s26, 4  ;;  %s558_s27 = int_to_ptr.vmem [resolvable:$true] %s557_s27 }
  0x13   :  { %v711_v52 = vld [vmem:[%s1056_s3 + $0x38] sm:$0xff]  ;;  %v708_v56 = vld [vmem:[%s1056_s3 + $0x20] sm:$0xff]  ;;  %v706_v59 = vld [vmem:[%s1056_s3 + $0x10] sm:$0xff]  ;;  %vm274_vm0 = vcmp.lt.s32.totalorder %v880_v9, 1  ;;  %vm340_vm1 = vcmp.lt.s32.totalorder %v880_v9, 2  ;;  %v243_v25 = vadd.s32 16, %v880_v9 }
  0x14   :  { %490 = vmatpush.bf16.msra.mxu2 %v711_v52  ;;  %v707_v58 = vld [vmem:[%s1056_s3 + $0x18] sm:$0xff]  ;;  %v705_v62 = vld [vmem:[%s1056_s3 + $0x8] sm:$0xff]  ;;  %v71_v63 = vld [vmem:[%s1055_s2] sm:$0x3] }
  0x15   :  { %184 = vmatpush.bf16.msra.mxu0 %v623_v22  ;;  %715 = vmatpush.bf16.msra.mxu3 %v623_v22  ;;  %v704_v0 = vld [vmem:[%s1056_s3] sm:$0xff]  ;;  %v876_v3 = vperm.slane %v71_v63, 0  ;;  %v249_v22 = vand.u32 15, %v880_v9  ;;  %v930_v45 = vperm.slane %v71_v63, 1 }
  0x16   :  { %213 = vmatpush.bf16.msra.mxu1 %v627_v23  ;;  %v239_v11 = vld [vmem:[%s1058_s5] sm:$0x7] }
  0x17   :  { %v890_v16 = vperm.slane %v239_v11, 2  ;;  %v892_v17 = vperm.slane %v239_v11, 1  ;;  %v900_v23 = vperm.slane %v239_v11, 0  ;;  %vm283_vm2 = vcmp.ge.s32.totalorder %v249_v22, 1 }
  0x18   :  { %491 = vmatpush.bf16.msra.mxu2 %v710_v53  ;;  %vm913_vm3 = vcmp.ge.s32.totalorder %v249_v22, 2 }
  0x19   :  { %185 = vmatpush.bf16.msra.mxu0 %v615_v28  ;;  %716 = vmatpush.bf16.msra.mxu3 %v615_v28 }
  0x1a   :  { %214 = vmatpush.bf16.msra.mxu1 %v619_v29 }
  0x1c   :  { %492 = vmatpush.bf16.msra.mxu2 %v709_v55 }
  0x1d   :  { %186 = vmatpush.bf16.msra.mxu0 %v607_v34  ;;  %717 = vmatpush.bf16.msra.mxu3 %v607_v34 }
  0x1e   :  { %215 = vmatpush.bf16.msra.mxu1 %v611_v35  ;;  %v251_v35 = vand.u32 15, %v243_v25 }
  0x20   :  { %493 = vmatpush.bf16.msra.mxu2 %v708_v56  ;;  %vm934_vm4 = vcmp.ge.s32.totalorder %v251_v35, 1  ;;  %vm956_vm5 = vcmp.ge.s32.totalorder %v251_v35, 2 }
  0x21   :  { %187 = vmatpush.bf16.msra.mxu0 %v599_v40  ;;  %718 = vmatpush.bf16.msra.mxu3 %v599_v40 }
  0x22   :  { %216 = vmatpush.bf16.msra.mxu1 %v603_v41 }
  0x24   :  { %494 = vmatpush.bf16.msra.mxu2 %v707_v58 }
  0x25   :  { %188 = vmatpush.bf16.msra.mxu0 %v591_v46  ;;  %719 = vmatpush.bf16.msra.mxu3 %v591_v46 }
  0x26   :  { %217 = vmatpush.bf16.msra.mxu1 %v595_v47  ;;  %v247_v47 = vadd.s32 48, %v880_v9 }
  0x28   :  { %189 = vmatmul.bf16.vlgmr.msra.gmra.mxu0 %v684_v48  ;;  %194 = vmatmul.bf16.vlgmr.msra.gmra.mxu3 %v685_v49 }
  0x29   :  { %218 = vmatmul.bf16.vlgmr.msra.gmra.mxu1 %v684_v48  ;;  %495 = vmatpush.bf16.msra.mxu2 %v706_v59  ;;  %v941_v48 = vld [vmem:[%s1059_s6] ss:$0 sm:$0xff] }
  0x2d   :  { %496 = vmatpush.bf16.msra.mxu2 %v705_v62 }
  0x31   :  { %497 = vmatpush.bf16.msra.mxu2 %v704_v0 }
  0x38   :  { %199 = vmatmul.bf16.gmra.mxu3 %v686_v50 }
  0x39   :  { %223 = vmatmul.bf16.gmra.mxu1 %v685_v49 }
  0x48   :  { %204 = vmatmul.bf16.gmra.mxu3 %v687_v51 }
  0x49   :  { %228 = vmatmul.bf16.gmra.mxu1 %v686_v50 }
  0x59   :  { %233 = vmatmul.bf16.gmra.mxu1 %v687_v51 }
  0xa5   :  { %v190_v60 = vpop.f32.mrf.mxu0 }
  0xa6   :  { %v219_v1 = vpop.f32.mrf.mxu1  ;;  %v191_v5 = vadd.f32 %v190_v60, %v876_v3 }
  0xa7   :  { %v220_v58 = vadd.f32 %v219_v1, %v930_v45  ;;  %v245_v1 = vadd.s32 32, %v880_v9 }
  0xa8   :  { %v266_v8 = vrot.slane %v191_v5, 7  ;;  %v332_v14 = vrot.slane %v191_v5, 6  ;;  %v258_v41 = vmul.f32 %v890_v16, %v191_v5 }
  0xa9   :  { %v253_v22 = vand.u32 15, %v245_v1 }
  0xab   :  { %v195_v54 = vpop.f32.mrf.mxu3  ;;  %vm287_vm6 = vcmp.ge.s32.totalorder %v253_v22, 1  ;;  %vm984_vm7 = vcmp.ge.s32.totalorder %v253_v22, 2 }
  0xac   :  { %v196_v27 = vadd.f32 %v195_v54, %v876_v3 }
  0xad   :  { %v192_v4 = vpop.f32.mrf.mxu0 }
  0xae   :  { %v193_v7 = vadd.f32 %v192_v4, %v876_v3  ;;  %v221_v13 = vpop.f32.mrf.mxu1  ;;  %v268_v42 = vrot.slane %v196_v27, 7  ;;  %v334_v55 = vrot.slane %v196_v27, 6  ;;  %v260_v11 = vmul.f32 %v890_v16, %v196_v27 }
  0xaf   :  { %v222_v52 = vadd.f32 %v221_v13, %v930_v45 }
  0xb0   :  { %v267_v12 = vrot.slane %v193_v7, 7  ;;  %v333_v18 = vrot.slane %v193_v7, 6  ;;  %v259_v19 = vmul.f32 %v890_v16, %v193_v7 }
  0xb2   :  { %v281_v15 = vsel %vm274_vm0, %v266_v8, %v267_v12  ;;  %v347_v21 = vsel %vm340_vm1, %v332_v14, %v333_v18  ;;  %v280_v46 = vsel %vm274_vm0, %v267_v12, %v268_v42  ;;  %v346_v62 = vsel %vm340_vm1, %v333_v18, %v334_v55 }
  0xb3   :  { %v197_v57 = vpop.f32.mrf.mxu3  ;;  %v317_v20 = vmul.f32 %v892_v17, %v281_v15  ;;  %v383_v29 = vmul.f32 %v900_v23, %v347_v21  ;;  %v309_v56 = vsel %vm934_vm4, %v280_v46, 0.0  ;;  %v375_v15 = vsel %vm956_vm5, %v346_v62, 0.0 }
  0xb4   :  { %v909_v30 = vadd.f32 %v197_v57, %v876_v3  ;;  %v318_v6 = vmul.f32 %v892_v17, %v309_v56  ;;  %v384_v21 = vmul.f32 %v900_v23, %v375_v15 }
  0xb5   :  { %v325_v28 = vadd.f32 %v317_v20, %v259_v19 }
  0xb6   :  { %v224_v34 = vpop.f32.mrf.mxu1  ;;  %v269_v38 = vrot.slane %v909_v30, 7  ;;  %v335_v57 = vrot.slane %v909_v30, 6  ;;  %v261_v5 = vmul.f32 %v890_v16, %v909_v30  ;;  %v326_v19 = vadd.f32 %v318_v6, %v260_v11 }
  0xb7   :  { %v391_v43 = vadd.f32 %v383_v29, %v325_v28  ;;  %v225_v35 = vadd.f32 %v224_v34, %v930_v45 }
  0xb8   :  { %v279_v51 = vsel %vm274_vm0, %v268_v42, %v269_v38  ;;  %v392_v28 = vadd.f32 %v384_v21, %v326_v19 }
  0xb9   :  { %v403_v53 = vadd.f32 %v941_v48, %v391_v43  ;;  %v319_v59 = vmul.f32 %v892_v17, %v279_v51 }
  0xbb   :  { %v863_v61 = vpop.f32.mrf.mxu3  ;;  %v411_v4 = vmul.f32 %v403_v53, %v222_v52  ;;  %v327_v12 = vadd.f32 %v319_v59, %v261_v5  ;;  %v255_v59 = vand.u32 15, %v247_v47 }
  0xbc   :  { %v201_v13 = vadd.f32 %v863_v61, %v876_v3 }
  0xbd   :  { %vm289_vm8 = vcmp.ge.s32.totalorder %v255_v59, 1  ;;  %vm355_vm9 = vcmp.ge.s32.totalorder %v255_v59, 2 }
  0xbe   :  { %v226_v0 = vpop.f32.mrf.mxu1 }
  0xbf   :  { %v227_v30 = vadd.f32 %v226_v0, %v930_v45 }
  0xc3   :  { %v874_v2 = vpop.f32.mrf.mxu3 }
  0xc4   :  { %v203_v18 = vadd.f32 %v874_v2, %v876_v3 }
  0xc6   :  { %v271_v27 = vrot.slane %v203_v18, 7  ;;  %v229_v29 = vpop.f32.mrf.mxu1  ;;  %v263_v34 = vmul.f32 %v890_v16, %v203_v18 }
  0xc7   :  { %v230_v5 = vadd.f32 %v229_v29, %v930_v45 }
  0xcb   :  { %v882_v10 = vpop.f32.mrf.mxu3 }
  0xcc   :  { %v206_v52 = vadd.f32 %v882_v10, %v876_v3 }
  0xce   :  { %v264_v19 = vmul.f32 %v890_v16, %v206_v52 }
  0xd3   :  { %v207_v24 = vpop.f32.mrf.mxu3 }
  0xd4   :  { %v904_v26 = vadd.f32 %v207_v24, %v876_v3  ;;  %v270_v24 = vrot.slane %v201_v13, 7 }
  0xd6   :  { %v273_v31 = vrot.slane %v904_v26, 7  ;;  %v339_v32 = vrot.slane %v904_v26, 6  ;;  %v278_v61 = vsel %vm274_vm0, %v269_v38, %v270_v24  ;;  %v277_v33 = vsel %vm274_vm0, %v270_v24, %v271_v27  ;;  %v49_v38 = vld [vmem:[%s1053_s0 + $0x8] sm:$0xff]  }
  0xd7   :  { %v321_v42 = vmul.f32 %v892_v17, %v277_v33  ;;  %v47_v33 = vld [vmem:[%s1053_s0] sm:$0xff]  }
  0xd8   :  { %v282_v36 = vsel %vm274_vm0, %v273_v31, %v266_v8  ;;  %v348_v37 = vsel %vm340_vm1, %v339_v32, %v332_v14  ;;  %v345_v8 = vsel %vm340_vm1, %v334_v55, %v335_v57  ;;  %v231_v55 = vpop.f32.mrf.mxu1 }
  0xd9   :  { %v307_v39 = vsel %vm283_vm2, %v282_v36, 0.0  ;;  %v373_v40 = vsel %vm913_vm3, %v348_v37, 0.0  ;;  %v385_v20 = vmul.f32 %v900_v23, %v345_v8  ;;  %v404_v36 = vadd.f32 %v941_v48, %v392_v28 }
  0xda   :  { %v316_v44 = vmul.f32 %v892_v17, %v307_v39  ;;  %v382_v50 = vmul.f32 %v900_v23, %v373_v40  ;;  %v336_v37 = vrot.slane %v201_v13, 6  ;;  %v311_v39 = vsel %vm287_vm6, %v278_v61, 0.0 }
  0xdb   :  { %v393_v25 = vadd.f32 %v385_v20, %v327_v12  ;;  %v337_v40 = vrot.slane %v203_v18, 6  ;;  %v412_v43 = vmul.f32 %v404_v36, %v225_v35  ;;  %v329_v51 = vadd.f32 %v321_v42, %v263_v34  ;;  %v725_v36 = vld [vmem:[%s1057_s4] ss:$0 sm:$0xff] }
  0xdc   :  { %v324_v49 = vadd.f32 %v316_v44, %v258_v41  ;;  %v320_v44 = vmul.f32 %v892_v17, %v311_v39  ;;  %v344_v46 = vsel %vm340_vm1, %v335_v57, %v336_v37  ;;  %v232_v3 = vadd.f32 %v231_v55, %v930_v45 }
  0xdd   :  { %v405_v2 = vadd.f32 %v941_v48, %v393_v25  ;;  %v528_v35 = vstv %s1060_s7 }
  0xde   :  { %v390_v54 = vadd.f32 %v382_v50, %v324_v49  ;;  %v343_v49 = vsel %vm340_vm1, %v336_v37, %v337_v40  ;;  %v262_v50 = vmul.f32 %v890_v16, %v201_v13 }
  0xdf   :  { %v413_v41 = vmul.f32 %v405_v2, %v227_v30  ;;  %v387_v57 = vmul.f32 %v900_v23, %v343_v49 }
  0xe0   :  { %v402_v60 = vadd.f32 %v941_v48, %v390_v54  ;;  %v377_v54 = vsel %vm984_vm7, %v344_v46, 0.0  ;;  %v328_v56 = vadd.f32 %v320_v44, %v262_v50  ;;  %v234_v8 = vpop.f32.mrf.mxu1  ;;  %v522_v46 = vunpack.c.l.bf16 %v49_v38 }
  0xe1   :  { %v419_v53 = vpack.c.bf16 %v413_v41, %v412_v43  ;;  %v395_v62 = vadd.f32 %v387_v57, %v329_v51  ;;  %v235_v9 = vadd.f32 %v234_v8, %v930_v45  ;;  %v523_v51 = vunpack.c.h.bf16 %v49_v38 }
  0xe2   :  { %v410_v7 = vmul.f32 %v402_v60, %v220_v58  ;;  %v386_v58 = vmul.f32 %v900_v23, %v377_v54  ;;  %v272_v60 = vrot.slane %v206_v52, 7  ;;  %v531_v34 = vmul.f32 %v528_v35, %v522_v46  ;;  %v51_v54 = vld [vmem:[%s1053_s0 + $0x10] sm:$0xff]  }
  0xe3   :  { %v407_v10 = vadd.f32 %v941_v48, %v395_v62  ;;  %v524_v57 = vunpack.c.l.bf16 %v51_v54 }
  0xe4   :  { %v418_v14 = vpack.c.bf16 %v411_v4, %v410_v7  ;;  %v394_v63 = vadd.f32 %v386_v58, %v328_v56  ;;  %v276_v0 = vsel %vm274_vm0, %v271_v27, %v272_v60  ;;  %v275_v4 = vsel %vm274_vm0, %v272_v60, %v273_v31 }
  0xe5   :  { %v338_v7 = vrot.slane %v206_v52, 6  ;;  %v313_v1 = vsel %vm289_vm8, %v276_v0, 0.0  ;;  %v415_v11 = vmul.f32 %v407_v10, %v232_v3  ;;  %v323_v12 = vmul.f32 %v892_v17, %v275_v4  ;;  %v53_v10 = vld [vmem:[%s1053_s0 + $0x18] sm:$0xff]  }
  0xe6   :  { %498 = vmatmul.bf16.vlgmr.msra.gmra.mxu2 %v418_v14  ;;  %v406_v6 = vadd.f32 %v941_v48, %v394_v63  ;;  %v322_v14 = vmul.f32 %v892_v17, %v313_v1  ;;  %v265_v31 = vmul.f32 %v890_v16, %v904_v26  ;;  %v532_v52 = vmul.f32 %v528_v35, %v523_v51 }
  0xe7   :  { %v342_v15 = vsel %vm340_vm1, %v337_v40, %v338_v7  ;;  %v341_v18 = vsel %vm340_vm1, %v338_v7, %v339_v32  ;;  %v521_v40 = vunpack.c.h.bf16 %v47_v33  ;;  %v533_v58 = vmul.f32 %v528_v35, %v524_v57 }
  0xe8   :  { %v414_v13 = vmul.f32 %v406_v6, %v230_v5  ;;  %v331_v20 = vadd.f32 %v323_v12, %v265_v31  ;;  %v379_v22 = vsel %vm355_vm9, %v342_v15, 0.0  ;;  %v330_v24 = vadd.f32 %v322_v14, %v264_v19  ;;  %v236_v28 = vpop.f32.mrf.mxu1 }
  0xe9   :  { %v389_v25 = vmul.f32 %v900_v23, %v341_v18  ;;  %v388_v17 = vmul.f32 %v900_v23, %v379_v22  ;;  %v237_v61 = vadd.f32 %v236_v28, %v930_v45  ;;  %v520_v23 = vunpack.c.l.bf16 %v47_v33 }
  0xea   :  { %v420_v21 = vpack.c.bf16 %v415_v11, %v414_v13  ;;  %v530_v41 = vmul.f32 %v528_v35, %v521_v40  ;;  %v525_v63 = vunpack.c.h.bf16 %v51_v54  ;;  %v526_v6 = vunpack.c.l.bf16 %v53_v10 }
  0xeb   :  { %v397_v27 = vadd.f32 %v389_v25, %v331_v20  ;;  %v396_v29 = vadd.f32 %v388_v17, %v330_v24  ;;  %v529_v45 = vmul.f32 %v528_v35, %v520_v23  ;;  %v527_v12 = vunpack.c.h.bf16 %v53_v10 }
  0xec   :  { %v534_v0 = vmul.f32 %v528_v35, %v525_v63  ;;  %v535_v7 = vmul.f32 %v528_v35, %v526_v6 }
  0xed   :  { %v409_v26 = vadd.f32 %v941_v48, %v397_v27  ;;  %v408_v16 = vadd.f32 %v941_v48, %v396_v29  ;;  %v536_v13 = vmul.f32 %v528_v35, %v527_v12 }
  0xef   :  { %v417_v32 = vmul.f32 %v409_v26, %v237_v61  ;;  %v416_v30 = vmul.f32 %v408_v16, %v235_v9 }
  0xf1   :  { %v421_v2 = vpack.c.bf16 %v417_v32, %v416_v30 }
  0xf6   :  { %503 = vmatmul.bf16.gmra.mxu2 %v419_v53 }
 0x106   :  { %508 = vmatmul.bf16.gmra.mxu2 %v420_v21 }
 0x116   :  { %513 = vmatmul.bf16.gmra.mxu2 %v421_v2 }
 0x169   :  { %v499_v37 = vpop.f32.mrf.mxu2 }
 0x16a   :  { %v500_v48 = vadd.f32 %v725_v36, %v499_v37 }
 0x16c   :  { %v537_v39 = vadd.f32 %v529_v45, %v500_v48 }
 0x16e   :  { %545 = vst [vmem:[#allocation6] sm:$0xff] %v537_v39 }
 0x171   :  { %v501_v42 = vpop.f32.mrf.mxu2 }
 0x172   :  { %v502_v43 = vadd.f32 %v725_v36, %v501_v42 }
 0x174   :  { %v538_v44 = vadd.f32 %v530_v41, %v502_v43 }
 0x176   :  { %546 = vst [vmem:[#allocation6 + $0x8] sm:$0xff] %v538_v44 }
 0x179   :  { %v504_v47 = vpop.f32.mrf.mxu2 }
 0x17a   :  { %v505_v49 = vadd.f32 %v725_v36, %v504_v47 }
 0x17c   :  { %v539_v50 = vadd.f32 %v531_v34, %v505_v49 }
 0x17e   :  { %547 = vst [vmem:[#allocation6 + $0x10] sm:$0xff] %v539_v50 }
 0x181   :  { %v506_v53 = vpop.f32.mrf.mxu2 }
 0x182   :  { %v507_v55 = vadd.f32 %v725_v36, %v506_v53 }
 0x184   :  { %v540_v56 = vadd.f32 %v532_v52, %v507_v55 }
 0x186   :  { %548 = vst [vmem:[#allocation6 + $0x18] sm:$0xff] %v540_v56 }
 0x189   :  { %v509_v59 = vpop.f32.mrf.mxu2 }
 0x18a   :  { %v510_v60 = vadd.f32 %v725_v36, %v509_v59 }
 0x18c   :  { %v541_v62 = vadd.f32 %v533_v58, %v510_v60 }
 0x18e   :  { %549 = vst [vmem:[#allocation6 + $0x20] sm:$0xff] %v541_v62 }
 0x191   :  { %v511_v3 = vpop.f32.mrf.mxu2 }
 0x192   :  { %v512_v4 = vadd.f32 %v725_v36, %v511_v3 }
 0x194   :  { %v542_v5 = vadd.f32 %v534_v0, %v512_v4 }
 0x196   :  { %550 = vst [vmem:[#allocation6 + $0x28] sm:$0xff] %v542_v5 }
 0x199   :  { %v514_v1 = vpop.f32.mrf.mxu2 }
 0x19a   :  { %v515_v8 = vadd.f32 %v725_v36, %v514_v1 }
 0x19c   :  { %v543_v11 = vadd.f32 %v535_v7, %v515_v8 }
 0x19e   :  { %551 = vst [vmem:[#allocation6 + $0x30] sm:$0xff] %v543_v11 }
 0x1a1   :  { %v516_v14 = vpop.f32.mrf.mxu2 }
 0x1a2   :  { %v517_v15 = vadd.f32 %v725_v36, %v516_v14 }
 0x1a4   :  { %v544_v31 = vadd.f32 %v536_v13, %v517_v15 }
 0x1a6   :  { %552 = vst [vmem:[#allocation6 + $0x38] sm:$0xff] %v544_v31 }
 0x1a7   :  { %565 = dma.vmem_to_hbm [thread:$0]  %s558_s27, 1024, %s560_s30, [#allocation5], %s779_s10, %s779_s10, %s780_s11  }
 0x1a8   :  { %776 = dma.done.wait [#allocation5], 1024  }
 0x1a9   :  { %777 = vsyncadd [#allocation5], 4294966272 }
 0x1aa   :  { %570 = vsyncpa [#allocation4], 1 }
 0x1ab   :  { %571 = vsyncpa [#allocation5], 1 }

</bundles_post_ra>
